<compile_context>
chip_gen: v7x
topology: tpu7x:2x2x1
jax: 0.10.0
libtpu: 0.0.40
codegen_flags: <defaults>
</compile_context>

<pallas_src>
import functools

import jax
import jax.numpy as jnp
from jax import lax
from jax.experimental import pallas as pl
from jax.experimental.pallas import tpu as pltpu


def _const_spec(shape):
    """BlockSpec for a small operand reused unchanged by every grid cell."""
    return pl.BlockSpec(shape, lambda *_: (0,) * len(shape))


def _stats_kernel(x_ref, w1_ref, b1_ref, w2_ref, sum_ref, sumsq_ref,
                  *, tile_hw, hw_valid, slope, need_mask):
    """Pass 1: per-tile partial sum / sum-of-squares of h2' (pre-norm, no b2)."""
    x = x_ref[0]                                                      # [c_in, THW]
    h1 = jnp.dot(w1_ref[...], x, preferred_element_type=jnp.float32) + b1_ref[...]
    h1 = jnp.where(h1 >= 0, h1, slope * h1).astype(w2_ref.dtype)      # LeakyReLU(0.2)
    h2 = jnp.dot(w2_ref[...], h1, preferred_element_type=jnp.float32)  # [c2, THW]
    if need_mask:
        # Zero the zero-padded pixel columns so they don't pollute the stats.
        col = pl.program_id(1) * tile_hw + lax.broadcasted_iota(
            jnp.int32, h2.shape, 1)
        h2 = jnp.where(col < hw_valid, h2, 0.0)
    sum_ref[...] = jnp.sum(h2, axis=1, keepdims=True)[None, None]     # [1,1,c2,1]
    sumsq_ref[...] = jnp.sum(h2 * h2, axis=1, keepdims=True)[None, None]


def _output_kernel(x_ref, w1_ref, b1_ref, w2_ref, scale_ref, shift_ref,
                   w3_ref, b3_ref, out_ref, *, slope):
    """Pass 2: recompute h2', apply folded BatchNorm + LeakyReLU + final conv."""
    x = x_ref[0]                                                      # [c_in, THW]
    h1 = jnp.dot(w1_ref[...], x, preferred_element_type=jnp.float32) + b1_ref[...]
    h1 = jnp.where(h1 >= 0, h1, slope * h1).astype(w2_ref.dtype)
    h2 = jnp.dot(w2_ref[...], h1, preferred_element_type=jnp.float32)  # no b2: cancels in BN
    h3 = h2 * scale_ref[...] + shift_ref[...]                         # folded BatchNorm
    h3 = jnp.where(h3 >= 0, h3, slope * h3).astype(w3_ref.dtype)
    out = jnp.dot(w3_ref[...], h3, preferred_element_type=jnp.float32) + b3_ref[...]
    out_ref[...] = out[None].astype(out_ref.dtype)                    # [1, 1, THW]


def pixel_discriminator(x, params, *, eps=1e-5, slope=0.2, max_tile_hw=2048,
                        compute_dtype=jnp.float32):
    """x: NCHW float32.  params: dict of conv/BN parameters (PyTorch layout)."""
    w1 = jnp.asarray(params["w1"], jnp.float32)     # [ndf, C_in, 1, 1]
    b1 = jnp.asarray(params["b1"], jnp.float32)     # [ndf]
    w2 = jnp.asarray(params["w2"], jnp.float32)     # [2*ndf, ndf, 1, 1]
    # params["b2"] is intentionally never added: it cancels exactly in the
    # BatchNorm centering (h2 - E[h2]) and is thus folded away.
    gamma = jnp.asarray(params["gamma"], jnp.float32)
    beta = jnp.asarray(params["beta"], jnp.float32)
    w3 = jnp.asarray(params["w3"], jnp.float32)     # [1, 2*ndf, 1, 1]
    b3 = jnp.asarray(params["b3"], jnp.float32)     # [1]

    B, c_in, H, W = x.shape
    ndf = w1.shape[0]
    c2 = w2.shape[0]
    hw = H * W
    M = B * hw

    # Pixel (lane) tiling: 128-aligned, as large as allowed; keep the total
    # grid >= 2 cells when possible so both v7x TensorCores get work.
    tile_hw = min(max_tile_hw, ((hw + 127) // 128) * 128)
    num_hw_tiles = pl.cdiv(hw, tile_hw)
    if B * num_hw_tiles < 2 and tile_hw > 128:
        tile_hw = ((tile_hw // 2 + 127) // 128) * 128
        num_hw_tiles = pl.cdiv(hw, tile_hw)
    hw_pad = num_hw_tiles * tile_hw
    need_mask = hw_pad != hw

    # NCHW -> [B, C_in, H*W]: a free reshape; channels on sublanes, pixels on
    # the 128-lane axis (lane-dense input DMAs and lane-dense output stores).
    x3 = x.reshape(B, c_in, hw).astype(compute_dtype)
    if need_mask:
        x3 = jnp.pad(x3, ((0, 0), (0, 0), (0, hw_pad - hw)))

    # PyTorch [out, in, 1, 1] weights are used directly as [out, in] matrices.
    w1m = w1.reshape(ndf, c_in).astype(compute_dtype)
    b1r = b1.reshape(ndf, 1)
    w2m = w2.reshape(c2, ndf).astype(compute_dtype)
    w3m = w3.reshape(1, c2).astype(compute_dtype)
    b3r = b3.reshape(1, 1)

    # VMEM budget from the real per-step footprint: double-buffered x/out
    # blocks, the h1/h2/h3 intermediates, and the resident constants.
    isz = jnp.dtype(compute_dtype).itemsize
    block_bytes = (
        2 * isz * c_in * tile_hw                      # x block (double buffered)
        + 2 * 4 * tile_hw                             # out block (double buffered)
        + 4 * tile_hw * (ndf + 2 * c2)                # h1 / h2 / h3 intermediates
        + isz * (c_in * ndf + ndf * c2 + c2)          # conv weights
        + 4 * (ndf + 4 * c2 + 1 + 2 * c2))            # biases, scale/shift, stats
    try:
        cap = int(pltpu.get_tpu_info().vmem_capacity_bytes)
    except Exception:
        cap = 64 << 20                                # conservative: v7x per-TC size
    vmem_limit = int(min((cap * 3) // 4, max(16 << 20, 2 * block_bytes)))
    cparams = pltpu.CompilerParams(
        dimension_semantics=("parallel", "parallel"),
        vmem_limit_bytes=vmem_limit)

    x_spec = pl.BlockSpec((1, c_in, tile_hw), lambda b, t: (b, 0, t))

    # ---- pass 1: partial BatchNorm statistics per pixel tile ----
    sums, sumsqs = pl.pallas_call(
        functools.partial(_stats_kernel, tile_hw=tile_hw, hw_valid=hw,
                          slope=slope, need_mask=need_mask),
        out_shape=(jax.ShapeDtypeStruct((B, num_hw_tiles, c2, 1), jnp.float32),
                   jax.ShapeDtypeStruct((B, num_hw_tiles, c2, 1), jnp.float32)),
        grid=(B, num_hw_tiles),
        in_specs=[x_spec,
                  _const_spec((ndf, c_in)),
                  _const_spec((ndf, 1)),
                  _const_spec((c2, ndf))],
        out_specs=(pl.BlockSpec((1, 1, c2, 1), lambda b, t: (b, t, 0, 0)),
                   pl.BlockSpec((1, 1, c2, 1), lambda b, t: (b, t, 0, 0))),
        compiler_params=cparams,
    )(x3, w1m, b1r, w2m)

    # ---- finalize BatchNorm (training-mode batch stats, biased variance) ----
    s = sums.reshape(-1, c2).sum(axis=0)
    sq = sumsqs.reshape(-1, c2).sum(axis=0)
    mean = s / M                                      # mean of bias-free h2'
    var = jnp.maximum(sq / M - mean * mean, 0.0)      # Var[h2] == Var[h2']
    inv = lax.rsqrt(var + eps)
    scale = (gamma * inv).reshape(c2, 1)
    shift = (beta - mean * gamma * inv).reshape(c2, 1)

    # ---- pass 2: recompute h2', fold norm, LeakyReLU, final 1x1 conv ----
    out3 = pl.pallas_call(
        functools.partial(_output_kernel, slope=slope),
        out_shape=jax.ShapeDtypeStruct((B, 1, hw_pad), jnp.float32),
        grid=(B, num_hw_tiles),
        in_specs=[x_spec,
                  _const_spec((ndf, c_in)),
                  _const_spec((ndf, 1)),
                  _const_spec((c2, ndf)),
                  _const_spec((c2, 1)),
                  _const_spec((c2, 1)),
                  _const_spec((1, c2)),
                  _const_spec((1, 1))],
        out_specs=pl.BlockSpec((1, 1, tile_hw), lambda b, t: (b, 0, t)),
        compiler_params=cparams,
    )(x3, w1m, b1r, w2m, scale, shift, w3m, b3r)

    if need_mask:
        out3 = out3[:, :, :hw]
    return out3.reshape(B, 1, H, W)                   # NCHW, no transpose needed


def _reference(x, params, eps=1e-5, slope=0.2):
    """Pure-JAX reference mirroring the PyTorch forward (training-mode BN)."""
    hp = jax.lax.Precision.HIGHEST
    B, C, H, W = x.shape
    ndf = params["w1"].shape[0]
    c2 = params["w2"].shape[0]
    xf = x.transpose(0, 2, 3, 1).reshape(-1, C)
    h1 = jnp.dot(xf, params["w1"].reshape(ndf, C).T, precision=hp) + params["b1"]
    h1 = jnp.where(h1 >= 0, h1, slope * h1)
    h2 = jnp.dot(h1, params["w2"].reshape(c2, ndf).T, precision=hp) + params["b2"]
    mean = h2.mean(axis=0)
    var = ((h2 - mean) ** 2).mean(axis=0)             # biased variance
    h2n = (h2 - mean) / jnp.sqrt(var + eps) * params["gamma"] + params["beta"]
    h3 = jnp.where(h2n >= 0, h2n, slope * h2n)
    out = jnp.dot(h3, params["w3"].reshape(1, c2).T, precision=hp) + params["b3"]
    return out.reshape(B, H, W, 1).transpose(0, 3, 1, 2)


if __name__ == "__main__":
    # Small shapes consistent with the module: batch=2, input_nc=4, 16x16 image,
    # ndf=64 (module default => 2*ndf = 128 channels on the sublane axis).
    B, C_in, H, W = 2, 4, 16, 16
    ndf = 64

    key = jax.random.PRNGKey(0)
    ks = jax.random.split(key, 9)
    params = dict(
        w1=0.1 * jax.random.normal(ks[0], (ndf, C_in, 1, 1), jnp.float32),
        b1=0.01 * jax.random.normal(ks[1], (ndf,), jnp.float32),
        w2=0.1 * jax.random.normal(ks[2], (2 * ndf, ndf, 1, 1), jnp.float32),
        b2=0.01 * jax.random.normal(ks[3], (2 * ndf,), jnp.float32),
        gamma=1.0 + 0.1 * jax.random.normal(ks[4], (2 * ndf,), jnp.float32),
        beta=0.05 * jax.random.normal(ks[5], (2 * ndf,), jnp.float32),
        w3=0.1 * jax.random.normal(ks[6], (1, 2 * ndf, 1, 1), jnp.float32),
        b3=0.01 * jax.random.normal(ks[7], (1,), jnp.float32),
    )
    x = jax.random.normal(ks[8], (B, C_in, H, W), dtype=jnp.float32)

    out = pixel_discriminator(x, params)
    jax.block_until_ready(out)

    ref = _reference(x, params)
    assert out.shape == (B, 1, H, W)
    assert jnp.allclose(out, ref, atol=1e-3, rtol=1e-3), \
        float(jnp.max(jnp.abs(out - ref)))

    print("KERNEL_OK")
</pallas_src>

<mosaic_0001>
module attributes {stable_mosaic.version = 11 : i64} {
  func.func @_stats_kernel(%arg0: i32, %arg1: i32, %arg2: memref<1x4x256xf32, #tpu.memory_space<vmem>>, %arg3: memref<64x4xf32, #tpu.memory_space<vmem>>, %arg4: memref<64x1xf32, #tpu.memory_space<vmem>>, %arg5: memref<128x64xf32, #tpu.memory_space<vmem>>, %arg6: memref<1x1x128x1xf32, #tpu.memory_space<vmem>>, %arg7: memref<1x1x128x1xf32, #tpu.memory_space<vmem>>) attributes {dimension_semantics = [#tpu.dimension_semantics<parallel>, #tpu.dimension_semantics<parallel>], iteration_bounds = array<i64: 2, 1>, scalar_prefetch = 0 : i64, scratch_operands = 0 : i64, tpu.core_type = #tpu.core_type<tc>, window_params = [{transform_indices = @transform_0, window_bounds = array<i64: 1, 4, 256>}, {pipeline_mode = #tpu.pipeline_mode<synchronous>, transform_indices = @transform_1, window_bounds = array<i64: 64, 4>}, {pipeline_mode = #tpu.pipeline_mode<synchronous>, transform_indices = @transform_2, window_bounds = array<i64: 64, 1>}, {pipeline_mode = #tpu.pipeline_mode<synchronous>, transform_indices = @transform_3, window_bounds = array<i64: 128, 64>}, {transform_indices = @transform_4, window_bounds = array<i64: 1, 1, 128, 1>}, {transform_indices = @transform_5, window_bounds = array<i64: 1, 1, 128, 1>}]} {
    %c0 = arith.constant 0 : index
    %c0_0 = arith.constant 0 : index
    %c0_1 = arith.constant 0 : index
    %0 = vector.load %arg2[%c0, %c0_0, %c0_1] : memref<1x4x256xf32, #tpu.memory_space<vmem>>, vector<1x4x256xf32>
    %1 = vector.shape_cast %0 : vector<1x4x256xf32> to vector<4x256xf32>
    %c0_2 = arith.constant 0 : index
    %c0_3 = arith.constant 0 : index
    %2 = vector.load %arg3[%c0_2, %c0_3] : memref<64x4xf32, #tpu.memory_space<vmem>>, vector<64x4xf32>
    %cst = arith.constant dense<0.000000e+00> : vector<64x256xf32>
    %3 = tpu.matmul %2, %1, %cst {dimension_numbers = #tpu.dot_dimension_numbers<[1], [0], [0], [1], [0, 0, 1, 1], [], []>} : vector<64x4xf32>, vector<4x256xf32>, vector<64x256xf32> -> vector<64x256xf32>
    %c0_4 = arith.constant 0 : index
    %c0_5 = arith.constant 0 : index
    %4 = vector.load %arg4[%c0_4, %c0_5] : memref<64x1xf32, #tpu.memory_space<vmem>>, vector<64x1xf32>
    %5 = vector.broadcast %4 : vector<64x1xf32> to vector<64x256xf32>
    %6 = arith.addf %3, %5 : vector<64x256xf32>
    %cst_6 = arith.constant 0.000000e+00 : f32
    %7 = vector.broadcast %cst_6 : f32 to vector<64x256xf32>
    %8 = arith.cmpf oge, %6, %7 : vector<64x256xf32>
    %cst_7 = arith.constant 2.000000e-01 : f32
    %9 = vector.broadcast %cst_7 : f32 to vector<64x256xf32>
    %10 = arith.mulf %9, %6 : vector<64x256xf32>
    %11 = arith.select %8, %6, %10 : vector<64x256xi1>, vector<64x256xf32>
    %c0_8 = arith.constant 0 : index
    %c0_9 = arith.constant 0 : index
    %12 = vector.load %arg5[%c0_8, %c0_9] : memref<128x64xf32, #tpu.memory_space<vmem>>, vector<128x64xf32>
    %cst_10 = arith.constant dense<0.000000e+00> : vector<128x256xf32>
    %13 = tpu.matmul %12, %11, %cst_10 {dimension_numbers = #tpu.dot_dimension_numbers<[1], [0], [0], [1], [0, 0, 1, 1], [], []>} : vector<128x64xf32>, vector<64x256xf32>, vector<128x256xf32> -> vector<128x256xf32>
    %cst_11 = arith.constant dense<0.000000e+00> : vector<128xf32>
    %14 = vector.multi_reduction <add>, %13, %cst_11 [1] : vector<128x256xf32> to vector<128xf32>
    %15 = vector.shape_cast %14 : vector<128xf32> to vector<128x1xf32>
    %16 = vector.shape_cast %15 : vector<128x1xf32> to vector<1x1x128x1xf32>
    %c0_12 = arith.constant 0 : index
    %c0_13 = arith.constant 0 : index
    %c0_14 = arith.constant 0 : index
    %c0_15 = arith.constant 0 : index
    %17 = vector.load %arg6[%c0_12, %c0_13, %c0_14, %c0_15] : memref<1x1x128x1xf32, #tpu.memory_space<vmem>>, vector<1x1x128x1xf32>
    tpu.vector_store %arg6[%c0_12, %c0_13, %c0_14, %c0_15], %16 {strides = array<i32>} : memref<1x1x128x1xf32, #tpu.memory_space<vmem>>, vector<1x1x128x1xf32>,
    %18 = arith.mulf %13, %13 : vector<128x256xf32>
    %cst_16 = arith.constant dense<0.000000e+00> : vector<128xf32>
    %19 = vector.multi_reduction <add>, %18, %cst_16 [1] : vector<128x256xf32> to vector<128xf32>
    %20 = vector.shape_cast %19 : vector<128xf32> to vector<128x1xf32>
    %21 = vector.shape_cast %20 : vector<128x1xf32> to vector<1x1x128x1xf32>
    %c0_17 = arith.constant 0 : index
    %c0_18 = arith.constant 0 : index
    %c0_19 = arith.constant 0 : index
    %c0_20 = arith.constant 0 : index
    %22 = vector.load %arg7[%c0_17, %c0_18, %c0_19, %c0_20] : memref<1x1x128x1xf32, #tpu.memory_space<vmem>>, vector<1x1x128x1xf32>
    tpu.vector_store %arg7[%c0_17, %c0_18, %c0_19, %c0_20], %21 {strides = array<i32>} : memref<1x1x128x1xf32, #tpu.memory_space<vmem>>, vector<1x1x128x1xf32>,
    return
  }
  func.func @transform_0(%arg0: i32, %arg1: i32) -> (i32, i32, i32) {
    %c0_i32 = arith.constant 0 : i32
    %c0_i32_0 = arith.constant 0 : i32
    return %arg0, %c0_i32, %arg1 : i32, i32, i32
  }
  func.func @transform_1(%arg0: i32, %arg1: i32) -> (i32, i32) {
    %c0_i32 = arith.constant 0 : i32
    %c0_i32_0 = arith.constant 0 : i32
    %c0_i32_1 = arith.constant 0 : i32
    return %c0_i32, %c0_i32_0 : i32, i32
  }
  func.func @transform_2(%arg0: i32, %arg1: i32) -> (i32, i32) {
    %c0_i32 = arith.constant 0 : i32
    %c0_i32_0 = arith.constant 0 : i32
    %c0_i32_1 = arith.constant 0 : i32
    return %c0_i32, %c0_i32_0 : i32, i32
  }
  func.func @transform_3(%arg0: i32, %arg1: i32) -> (i32, i32) {
    %c0_i32 = arith.constant 0 : i32
    %c0_i32_0 = arith.constant 0 : i32
    %c0_i32_1 = arith.constant 0 : i32
    return %c0_i32, %c0_i32_0 : i32, i32
  }
  func.func @transform_4(%arg0: i32, %arg1: i32) -> (i32, i32, i32, i32) {
    %c0_i32 = arith.constant 0 : i32
    %c0_i32_0 = arith.constant 0 : i32
    %c0_i32_1 = arith.constant 0 : i32
    return %arg0, %arg1, %c0_i32, %c0_i32_0 : i32, i32, i32, i32
  }
  func.func @transform_5(%arg0: i32, %arg1: i32) -> (i32, i32, i32, i32) {
    %c0_i32 = arith.constant 0 : i32
    %c0_i32_0 = arith.constant 0 : i32
    %c0_i32_1 = arith.constant 0 : i32
    return %arg0, %arg1, %c0_i32, %c0_i32_0 : i32, i32, i32, i32
  }
}

</mosaic_0001>

<bundles_post_ra>
// kernel: tpu_custom_call.1
= control target key start
LH: loop header
LB: loop body
LE: loop exit
PB: predicated region body
PF: predicated region fallthrough
CT: control target
= control target key end

     0   :  { %s1216_s18 = smov 0   ;;  %s1218_s19 = smov 0   ;;  %s1468_s0 = inlined_call_operand.vmem [shape: f32[2,4,256], index: 0, kind: input, shape index: {}]   ;;  %s1469_s1 = inlined_call_operand.vmem [shape: f32[64,4], index: 1, kind: input, shape index: {}]   ;;  %s1470_s2 = inlined_call_operand.vmem [shape: f32[64,1], index: 2, kind: input, shape index: {}]   ;;  %s1471_s3 = inlined_call_operand.vmem [shape: f32[128,64], index: 3, kind: input, shape index: {}]   ;;  %s1472_s4 = inlined_call_operand.vmem [shape: f32[2,1,128,1], index: 4, kind: output, shape index: {0}]   ;;  %s1473_s5 = inlined_call_operand.vmem [shape: f32[2,1,128,1], index: 5, kind: output, shape index: {1}]  }
   0x1   :  { %s1220_s20 = smov 0  }
   0x2 LB: > { %s28_s21 = sadd.s32 1, %s1178_s19  ;;  %p1069_p0 = scmp.ge.s32.totalorder %s1182_s20, 1  ;;  %s1182_s20 = sphi %s1220_s20, %s16_s20   ;;  %s1178_s19 = sphi %s1218_s19, %s1475_s19   ;;  %s1174_s18 = sphi %s1216_s18, %s1474_s18  }
   0x3   : > { %p30_p1 = scmp.ge.s32.totalorder %s28_s21, 2  ;;  %p213_p2 = scmp.lt.s32.totalorder %s1182_s20, 3 }
   0x5   : > { %s1477_s21 = smov (%p30_p1, %s28_s21), 0  ;;  %p214_p3 = pnand %p1069_p0, %p213_p2 }
   0x6   : > { %p259_p4 = scmp.lt.s32.totalorder (!%p214_p3), %s1174_s18, 1  ;;  %v1184_v0 = vmov (!%p214_p3), 0.0   ;;  %v1185_v1 = vmov (!%p214_p3), 0   ;;  %v295_v2 = vld [vmem:[%s1470_s2] sm:$0xff] (!%p214_p3)  ;;  %v297_v3 = vld [vmem:[%s1470_s2 + $0x10] sm:$0xff] (!%p214_p3)  ;;  %v296_v4 = vld [vmem:[%s1470_s2 + $0x8] sm:$0xff] (!%p214_p3) }
   0x7   : > { %217 = sbr.rel (%p214_p3) target bundleno = 696 (0x2b8), region = 36  ;;  %439 = vmatprep.mubr.f32.mxu0 (!%p214_p3), %v1184_v0  ;;  %695 = vmatprep.mubr.f32.mxu1 (!%p214_p3), %v1184_v0  ;;  %v298_v5 = vld [vmem:[%s1470_s2 + $0x18] sm:$0xff] (!%p214_p3)  ;;  %vm370_vm0 = vcmask (!%p214_p3), 1043456   ;;  %v287_v8 = vld [vmem:[%s1469_s1] sm:$0xff] (!%p214_p3)  ;;  %vm345_vm1 = vcmask (!%p214_p3), 31744   ;;  %v300_v10 = vld [vmem:[%s1470_s2 + $0x28] sm:$0xff] (!%p214_p3) }
   0x8   : > { %1157 = vset.pattern.permute.xlu0 (!%p214_p3), %v1185_v1  ;;  %1158 = vset.pattern.permute.xlu1 (!%p214_p3), %v1185_v1  ;;  %v299_v9 = vld [vmem:[%s1470_s2 + $0x20] sm:$0xff] (!%p214_p3)  ;;  %v288_v11 = vld [vmem:[%s1469_s1 + $0x8] sm:$0xff] (!%p214_p3)  ;;  %v301_v12 = vld [vmem:[%s1470_s2 + $0x30] sm:$0xff] (!%p214_p3) }
   0x9   : > { %305 = vperm.xlu0 (!%p214_p3), %1157, %v295_v2   ;;  %315 = vperm.xlu1 (!%p214_p3), %1158, %v297_v3   ;;  %v302_v13 = vld [vmem:[%s1470_s2 + $0x38] sm:$0xff] (!%p214_p3)  ;;  %v289_v14 = vld [vmem:[%s1469_s1 + $0x10] sm:$0xff] (!%p214_p3)  ;;  %v291_v16 = vld [vmem:[%s1469_s1 + $0x20] sm:$0xff] (!%p214_p3) }
   0xa   : > { %v290_v15 = vld [vmem:[%s1469_s1 + $0x18] sm:$0xff] (!%p214_p3)  ;;  %v292_v17 = vld [vmem:[%s1469_s1 + $0x28] sm:$0xff] (!%p214_p3)  ;;  %v293_v18 = vld [vmem:[%s1469_s1 + $0x30] sm:$0xff] (!%p214_p3) }
   0xb   : > { %v294_v19 = vld [vmem:[%s1469_s1 + $0x38] sm:$0xff] (!%p214_p3) }
   0xd   : > { %310 = vperm.xlu0 (!%p214_p3), %1157, %v296_v4   ;;  %320 = vperm.xlu1 (!%p214_p3), %1158, %v298_v5  }
   0xe   : > { %s1479_s18 = smov (!%p259_p4, %s1174_s18), 1 }
   0xf   : > { %s1104_s26 = sshll.u32 %s1479_s18, 3  ;;  %s1105_s27 = sshll.u32 %s1479_s18, 7 }
  0x10   : > { %s266_s29 = scalar_lea.vmem %s1468_s0, %s1104_s26  ;;  %s1388_s30 = scalar_lea.vmem %s1472_s4, %s1105_s27 }
  0x11   : > { %v286_v6 = vld [vmem:[%s266_s29] sm:$0xff]  ;;  %325 = vperm.xlu0 %1157, %v299_v9   ;;  %330 = vperm.xlu1 %1158, %v300_v10   ;;  %s1393_s8 = scalar_lea.vmem %s1473_s5, %s1105_s27 }
  0x12   : > { %v344_v7 = vcombine.high %v286_v6, %v286_v6 }
  0x14   : > { %1076 = vmatprep.subr.msk.mxu0 %vm370_vm0, %v344_v7 }
  0x15   : > { %1077 = vmatpush1.msk.msra.mxu0 %vm370_vm0, %v286_v6  ;;  %335 = vperm.xlu0 %1157, %v301_v12  }
  0x16   : > { %1078 = vmatmul.mubr.msk.f32.vlgmr.msra.gmra.mrb[0].mxu0 %vm345_vm1, %v287_v8  ;;  %340 = vperm.xlu1 %1158, %v302_v13  }
  0x17   : > { %445 = vmatprep.mubr.f32.mxu0 %v1184_v0 }
  0x1a   : > { %1079 = vmatmul.mubr.msk.f32.gmra.mrb[2].mxu0 %vm345_vm1, %v288_v11 }
  0x1b   : > { %451 = vmatprep.mubr.f32.mxu0 %v1184_v0 }
  0x1e   : > { %1080 = vmatmul.mubr.msk.f32.gmra.mrb[4].mxu0 %vm345_vm1, %v289_v14 }
  0x1f   : > { %457 = vmatprep.mubr.f32.mxu0 %v1184_v0 }
  0x22   : > { %1081 = vmatmul.mubr.msk.f32.gmra.mrb[6].mxu0 %vm345_vm1, %v290_v15 }
  0x23   : > { %463 = vmatprep.mubr.f32.mxu0 %v1184_v0 }
  0x26   : > { %1082 = vmatmul.mubr.msk.f32.gmra.mrb[8].mxu0 %vm345_vm1, %v291_v16 }
  0x27   : > { %469 = vmatprep.mubr.f32.mxu0 %v1184_v0 }
  0x2a   : > { %1083 = vmatmul.mubr.msk.f32.gmra.mrb[10].mxu0 %vm345_vm1, %v292_v17 }
  0x2b   : > { %475 = vmatprep.mubr.f32.mxu0 %v1184_v0 }
  0x2e   : > { %1084 = vmatmul.mubr.msk.f32.gmra.mrb[12].mxu0 %vm345_vm1, %v293_v18 }
  0x2f   : > { %481 = vmatprep.mubr.f32.mxu0 %v1184_v0 }
  0x32   : > { %1085 = vmatmul.mubr.msk.f32.gmra.mrb[14].mxu0 %vm345_vm1, %v294_v19 }
  0x33   : > { %665 = vmatprep.mubr.f32.mxu0 %v1184_v0 }
  0x88   : > { %v306_v20 = vpop.permute.xlu0 %305  ;;  %v316_v30 = vpop.permute.xlu1 %315 }
  0x8c   : > { %v311_v24 = vpop.permute.xlu0 %310  ;;  %v321_v45 = vpop.permute.xlu1 %320 }
  0x90   : > { %v326_v53 = vpop.permute.xlu0 %325  ;;  %v331_v2 = vpop.permute.xlu1 %330 }
  0x94   : > { %v336_v10 = vpop.permute.xlu0 %335 }
  0xe9   : > { %v441_v21 = vpop.f32.mrb[0].mxu0 }
  0xea   : > { %v442_v22 = vadd.f32 %v441_v21, %v306_v20  ;;  %v443_v23 = vpop.f32.mrb[1].mxu0 }
  0xeb   : > { %v444_v25 = vadd.f32 %v443_v23, %v306_v20 }
  0xec   : > { %v504_v27 = vmul.f32 0.2, %v442_v22  ;;  %vm488_vm2 = vcmp.ge.f32.partialorder %v442_v22, 0.0 }
  0xed   : > { %v447_v26 = vpop.f32.mrb[2].mxu0  ;;  %v505_v31 = vmul.f32 0.2, %v444_v25  ;;  %vm489_vm3 = vcmp.ge.f32.partialorder %v444_v25, 0.0 }
  0xee   : > { %v448_v28 = vadd.f32 %v447_v26, %v311_v24  ;;  %v449_v29 = vpop.f32.mrb[3].mxu0  ;;  %v520_v36 = vsel %vm488_vm2, %v442_v22, %v504_v27  ;;  %v341_v22 = vpop.permute.xlu1 %340  ;;  %vm552_vm2 = vcmask 523264  }
  0xef   : > { %v450_v32 = vadd.f32 %v449_v29, %v311_v24  ;;  %v521_v42 = vsel %vm489_vm3, %v444_v25, %v505_v31  ;;  %vm810_vm3 = vcmask 7168  }
  0xf0   : > { %vm490_vm4 = vcmp.ge.f32.partialorder %v448_v28, 0.0  ;;  %v506_v33 = vmul.f32 0.2, %v448_v28 }
  0xf1   : > { %vm491_vm5 = vcmp.ge.f32.partialorder %v450_v32, 0.0  ;;  %v507_v34 = vmul.f32 0.2, %v450_v32  ;;  %v453_v35 = vpop.f32.mrb[4].mxu0 }
  0xf2   : > { %v522_v37 = vsel %vm490_vm4, %v448_v28, %v506_v33  ;;  %v454_v38 = vadd.f32 %v453_v35, %v316_v30  ;;  %v455_v39 = vpop.f32.mrb[5].mxu0 }
  0xf3   : > { %v1109_v40 = vpack.c.bf16 %v522_v37, %v520_v36  ;;  %v456_v41 = vadd.f32 %v455_v39, %v316_v30  ;;  %v523_v43 = vsel %vm491_vm5, %v450_v32, %v507_v34  ;;  %v536_v37 = vld [vmem:[%s1471_s3] sm:$0xff]  ;;  %v537_v39 = vld [vmem:[%s1471_s3 + $0x8] sm:$0xff] }
  0xf4   : > { %v1107_v44 = vpack.c.bf16 %v523_v43, %v521_v42  ;;  %v508_v47 = vmul.f32 0.2, %v454_v38  ;;  %vm492_vm6 = vcmp.ge.f32.partialorder %v454_v38, 0.0  ;;  %v543_v42 = vld [vmem:[%s1471_s3 + $0x38] sm:$0xff]  ;;  %v544_v43 = vld [vmem:[%s1471_s3 + $0x40] sm:$0xff] }
  0xf5   : > { %v459_v46 = vpop.f32.mrb[6].mxu0  ;;  %v509_v50 = vmul.f32 0.2, %v456_v41  ;;  %vm493_vm7 = vcmp.ge.f32.partialorder %v456_v41, 0.0 }
  0xf6   : > { %v460_v48 = vadd.f32 %v459_v46, %v321_v45  ;;  %v461_v49 = vpop.f32.mrb[7].mxu0  ;;  %1108 = vmatprep.subr.bf16.mxu0 %v1107_v44  ;;  %1123 = vmatprep.subr.bf16.mxu1 %v1107_v44  ;;  %v524_v56 = vsel %vm492_vm6, %v454_v38, %v508_v47  ;;  %v541_v38 = vld [vmem:[%s1471_s3 + $0x28] sm:$0xff]  ;;  %v539_v44 = vld [vmem:[%s1471_s3 + $0x18] sm:$0xff]  ;;  %v546_v47 = vld [vmem:[%s1471_s3 + $0x50] sm:$0xff] }
  0xf7   : > { %v462_v51 = vadd.f32 %v461_v49, %v321_v45  ;;  %1110 = vmatpush1.bf16.msra.mxu0 %v1109_v40  ;;  %1127 = vmatpush1.bf16.msra.mxu1 %v1109_v40  ;;  %v525_v62 = vsel %vm493_vm7, %v456_v41, %v509_v50  ;;  %v542_v40 = vld [vmem:[%s1471_s3 + $0x30] sm:$0xff]  ;;  %v540_v45 = vld [vmem:[%s1471_s3 + $0x20] sm:$0xff]  ;;  %v545_v46 = vld [vmem:[%s1471_s3 + $0x48] sm:$0xff] }
  0xf8   : > { %vm494_vm8 = vcmp.ge.f32.partialorder %v460_v48, 0.0  ;;  %v510_v52 = vmul.f32 0.2, %v460_v48  ;;  %v538_v41 = vld [vmem:[%s1471_s3 + $0x10] sm:$0xff]  ;;  %v548_v49 = vld [vmem:[%s1471_s3 + $0x60] sm:$0xff]  ;;  %v549_v50 = vld [vmem:[%s1471_s3 + $0x68] sm:$0xff] }
  0xf9   : > { %vm495_vm9 = vcmp.ge.f32.partialorder %v462_v51, 0.0  ;;  %v511_v54 = vmul.f32 0.2, %v462_v51  ;;  %v465_v55 = vpop.f32.mrb[8].mxu0 }
  0xfa   : > { %v526_v57 = vsel %vm494_vm8, %v460_v48, %v510_v52  ;;  %v466_v58 = vadd.f32 %v465_v55, %v326_v53  ;;  %v467_v59 = vpop.f32.mrb[9].mxu0  ;;  %v547_v48 = vld [vmem:[%s1471_s3 + $0x58] sm:$0xff] }
  0xfb   : > { %v1113_v60 = vpack.c.bf16 %v526_v57, %v524_v56  ;;  %v468_v61 = vadd.f32 %v467_v59, %v326_v53  ;;  %v527_v63 = vsel %vm495_vm9, %v462_v51, %v511_v54  ;;  %v550_v51 = vld [vmem:[%s1471_s3 + $0x70] sm:$0xff]  ;;  %v551_v52 = vld [vmem:[%s1471_s3 + $0x78] sm:$0xff] }
  0xfc   : > { %v1111_v1 = vpack.c.bf16 %v527_v63, %v525_v62  ;;  %v512_v4 = vmul.f32 0.2, %v466_v58  ;;  %vm496_vm10 = vcmp.ge.f32.partialorder %v466_v58, 0.0 }
  0xfd   : > { %v471_v3 = vpop.f32.mrb[10].mxu0  ;;  %v513_v7 = vmul.f32 0.2, %v468_v61  ;;  %vm497_vm11 = vcmp.ge.f32.partialorder %v468_v61, 0.0 }
  0xfe   : > { %v472_v5 = vadd.f32 %v471_v3, %v331_v2  ;;  %v473_v6 = vpop.f32.mrb[11].mxu0  ;;  %1112 = vmatprep.subr.bf16.mxu0 %v1111_v1  ;;  %1124 = vmatprep.subr.bf16.mxu1 %v1111_v1  ;;  %v528_v13 = vsel %vm496_vm10, %v466_v58, %v512_v4 }
  0xff   : > { %v474_v8 = vadd.f32 %v473_v6, %v331_v2  ;;  %1114 = vmatpush1.bf16.msra.mxu0 %v1113_v60  ;;  %1128 = vmatpush1.bf16.msra.mxu1 %v1113_v60  ;;  %v529_v19 = vsel %vm497_vm11, %v468_v61, %v513_v7 }
 0x100   : > { %vm498_vm12 = vcmp.ge.f32.partialorder %v472_v5, 0.0  ;;  %v514_v9 = vmul.f32 0.2, %v472_v5 }
 0x101   : > { %vm499_vm13 = vcmp.ge.f32.partialorder %v474_v8, 0.0  ;;  %v515_v11 = vmul.f32 0.2, %v474_v8  ;;  %v477_v12 = vpop.f32.mrb[12].mxu0 }
 0x102   : > { %v530_v14 = vsel %vm498_vm12, %v472_v5, %v514_v9  ;;  %v478_v15 = vadd.f32 %v477_v12, %v336_v10  ;;  %v479_v16 = vpop.f32.mrb[13].mxu0 }
 0x103   : > { %v1117_v17 = vpack.c.bf16 %v530_v14, %v528_v13  ;;  %v480_v18 = vadd.f32 %v479_v16, %v336_v10  ;;  %v531_v20 = vsel %vm499_vm13, %v474_v8, %v515_v11 }
 0x104   : > { %v1115_v21 = vpack.c.bf16 %v531_v20, %v529_v19  ;;  %v516_v24 = vmul.f32 0.2, %v478_v15  ;;  %vm500_vm14 = vcmp.ge.f32.partialorder %v478_v15, 0.0 }
 0x105   : > { %v483_v23 = vpop.f32.mrb[14].mxu0  ;;  %v517_v27 = vmul.f32 0.2, %v480_v18  ;;  %vm501_vm15 = vcmp.ge.f32.partialorder %v480_v18, 0.0 }
 0x106   : > { %v484_v25 = vadd.f32 %v483_v23, %v341_v22  ;;  %v485_v26 = vpop.f32.mrb[15].mxu0  ;;  %1116 = vmatprep.subr.bf16.mxu0 %v1115_v21  ;;  %1125 = vmatprep.subr.bf16.mxu1 %v1115_v21  ;;  %v532_v31 = vsel %vm500_vm14, %v478_v15, %v516_v24 }
 0x107   : > { %v486_v28 = vadd.f32 %v485_v26, %v341_v22  ;;  %1118 = vmatpush1.bf16.msra.mxu0 %v1117_v17  ;;  %1129 = vmatpush1.bf16.msra.mxu1 %v1117_v17  ;;  %v533_v34 = vsel %vm501_vm15, %v480_v18, %v517_v27 }
 0x108   : > { %vm502_vm0 = vcmp.ge.f32.partialorder %v484_v25, 0.0  ;;  %v518_v29 = vmul.f32 0.2, %v484_v25 }
 0x109   : > { %vm503_vm1 = vcmp.ge.f32.partialorder %v486_v28, 0.0  ;;  %v519_v30 = vmul.f32 0.2, %v486_v28 }
 0x10a   : > { %v534_v32 = vsel %vm502_vm0, %v484_v25, %v518_v29 }
 0x10b   : > { %v1121_v33 = vpack.c.bf16 %v534_v32, %v532_v31  ;;  %v535_v35 = vsel %vm503_vm1, %v486_v28, %v519_v30 }
 0x10c   : > { %v1119_v36 = vpack.c.bf16 %v535_v35, %v533_v34 }
 0x10e   : > { %1120 = vmatprep.subr.bf16.mxu0 %v1119_v36  ;;  %1126 = vmatprep.subr.bf16.mxu1 %v1119_v36 }
 0x10f   : > { %1122 = vmatpush1.bf16.msra.mxu0 %v1121_v33  ;;  %1130 = vmatpush1.bf16.msra.mxu1 %v1121_v33 }
 0x112   : > { %1086 = vmatmul.mubr.msk.f32.vlgmr.msra.gmra.mrb[16].mxu0 %vm552_vm2, %v536_v37  ;;  %1091 = vmatmul.mubr.msk.f32.vlgmr.msra.gmra.mrb[0].mxu1 %vm552_vm2, %v541_v38 }
 0x113   : > { %671 = vmatprep.mubr.f32.mxu0 %v1184_v0  ;;  %701 = vmatprep.mubr.f32.mxu1 %v1184_v0 }
 0x116   : > { %1087 = vmatmul.mubr.msk.f32.gmra.mrb[18].mxu0 %vm552_vm2, %v537_v39  ;;  %1092 = vmatmul.mubr.msk.f32.gmra.mrb[2].mxu1 %vm552_vm2, %v542_v40 }
 0x117   : > { %677 = vmatprep.mubr.f32.mxu0 %v1184_v0  ;;  %707 = vmatprep.mubr.f32.mxu1 %v1184_v0 }
 0x11a   : > { %1088 = vmatmul.mubr.msk.f32.gmra.mrb[20].mxu0 %vm552_vm2, %v538_v41  ;;  %1093 = vmatmul.mubr.msk.f32.gmra.mrb[4].mxu1 %vm552_vm2, %v543_v42 }
 0x11b   : > { %713 = vmatprep.mubr.f32.mxu1 %v1184_v0  ;;  %683 = vmatprep.mubr.f32.mxu0 %v1184_v0 }
 0x11e   : > { %1094 = vmatmul.mubr.msk.f32.gmra.mrb[6].mxu1 %vm552_vm2, %v544_v43  ;;  %1089 = vmatmul.mubr.msk.f32.gmra.mrb[22].mxu0 %vm552_vm2, %v539_v44 }
 0x11f   : > { %689 = vmatprep.mubr.f32.mxu0 %v1184_v0  ;;  %719 = vmatprep.mubr.f32.mxu1 %v1184_v0 }
 0x122   : > { %1090 = vmatmul.mubr.msk.f32.gmra.mrb[24].mxu0 %vm552_vm2, %v540_v45  ;;  %1095 = vmatmul.mubr.msk.f32.gmra.mrb[8].mxu1 %vm552_vm2, %v545_v46 }
 0x123   : > { %725 = vmatprep.mubr.f32.mxu1 %v1184_v0 }
 0x126   : > { %1096 = vmatmul.mubr.msk.f32.gmra.mrb[10].mxu1 %vm552_vm2, %v546_v47 }
 0x127   : > { %731 = vmatprep.mubr.f32.mxu1 %v1184_v0 }
 0x12a   : > { %1097 = vmatmul.mubr.msk.f32.gmra.mrb[12].mxu1 %vm552_vm2, %v547_v48 }
 0x12b   : > { %737 = vmatprep.mubr.f32.mxu1 %v1184_v0 }
 0x12e   : > { %1098 = vmatmul.mubr.msk.f32.gmra.mrb[14].mxu1 %vm552_vm2, %v548_v49 }
 0x12f   : > { %743 = vmatprep.mubr.f32.mxu1 %v1184_v0 }
 0x132   : > { %1099 = vmatmul.mubr.msk.f32.gmra.mrb[16].mxu1 %vm552_vm2, %v549_v50 }
 0x133   : > { %749 = vmatprep.mubr.f32.mxu1 %v1184_v0 }
 0x136   : > { %1100 = vmatmul.mubr.msk.f32.gmra.mrb[18].mxu1 %vm552_vm2, %v550_v51 }
 0x137   : > { %755 = vmatprep.mubr.f32.mxu1 %v1184_v0 }
 0x13a   : > { %1101 = vmatmul.mubr.msk.f32.gmra.mrb[20].mxu1 %vm552_vm2, %v551_v52 }
 0x1e5   : > { %v667_v53 = vpop.f32.mrb[16].mxu0  ;;  %v697_v54 = vpop.f32.mrb[0].mxu1 }
 0x1e6   : > { %v827_v55 = vmul.f32 %v667_v53, %v667_v53  ;;  %v669_v56 = vpop.f32.mrb[17].mxu0  ;;  %v837_v57 = vmul.f32 %v697_v54, %v697_v54  ;;  %v699_v58 = vpop.f32.mrb[1].mxu1 }
 0x1e7   : > { %v828_v59 = vmul.f32 %v669_v56, %v669_v56  ;;  %v762_v60 = vadd.f32 %v669_v56, %v667_v53  ;;  %v838_v61 = vmul.f32 %v699_v58, %v699_v58  ;;  %v777_v62 = vadd.f32 %v699_v58, %v697_v54 }
 0x1e9   : > { %763 = vadd.xlane.f32.xlu0 %v762_v60  ;;  %v859_v63 = vadd.f32 %v828_v59, %v827_v55  ;;  %v673_v1 = vpop.f32.mrb[18].mxu0  ;;  %v703_v0 = vpop.f32.mrb[2].mxu1  ;;  %v874_v2 = vadd.f32 %v838_v61, %v837_v57 }
 0x1ea   : > { %v829_v3 = vmul.f32 %v673_v1, %v673_v1  ;;  %v675_v4 = vpop.f32.mrb[19].mxu0  ;;  %v839_v5 = vmul.f32 %v703_v0, %v703_v0  ;;  %v705_v6 = vpop.f32.mrb[3].mxu1 }
 0x1eb   : > { %860 = vadd.xlane.f32.xlu1 %v859_v63  ;;  %v830_v7 = vmul.f32 %v675_v4, %v675_v4  ;;  %v765_v8 = vadd.f32 %v675_v4, %v673_v1  ;;  %v840_v9 = vmul.f32 %v705_v6, %v705_v6  ;;  %v780_v10 = vadd.f32 %v705_v6, %v703_v0 }
 0x1ed   : > { %778 = vadd.xlane.f32.xlu0 %v777_v62  ;;  %v862_v11 = vadd.f32 %v830_v7, %v829_v3  ;;  %v679_v12 = vpop.f32.mrb[20].mxu0  ;;  %v709_v13 = vpop.f32.mrb[4].mxu1  ;;  %v877_v14 = vadd.f32 %v840_v9, %v839_v5 }
 0x1ee   : > { %v831_v15 = vmul.f32 %v679_v12, %v679_v12  ;;  %v681_v16 = vpop.f32.mrb[21].mxu0  ;;  %v841_v17 = vmul.f32 %v709_v13, %v709_v13  ;;  %v711_v18 = vpop.f32.mrb[5].mxu1 }
 0x1ef   : > { %766 = vadd.xlane.f32.xlu1 %v765_v8  ;;  %v832_v19 = vmul.f32 %v681_v16, %v681_v16  ;;  %v768_v20 = vadd.f32 %v681_v16, %v679_v12  ;;  %v842_v21 = vmul.f32 %v711_v18, %v711_v18  ;;  %v783_v22 = vadd.f32 %v711_v18, %v709_v13 }
 0x1f1   : > { %875 = vadd.xlane.f32.xlu0 %v874_v2  ;;  %v715_v23 = vpop.f32.mrb[6].mxu1  ;;  %v865_v24 = vadd.f32 %v832_v19, %v831_v15  ;;  %v880_v25 = vadd.f32 %v842_v21, %v841_v17  ;;  %v685_v26 = vpop.f32.mrb[22].mxu0 }
 0x1f2   : > { %v843_v27 = vmul.f32 %v715_v23, %v715_v23  ;;  %v717_v28 = vpop.f32.mrb[7].mxu1  ;;  %v833_v29 = vmul.f32 %v685_v26, %v685_v26  ;;  %v687_v30 = vpop.f32.mrb[23].mxu0 }
 0x1f3   : > { %781 = vadd.xlane.f32.xlu1 %v780_v10  ;;  %v844_v31 = vmul.f32 %v717_v28, %v717_v28  ;;  %v786_v32 = vadd.f32 %v717_v28, %v715_v23  ;;  %v834_v33 = vmul.f32 %v687_v30, %v687_v30  ;;  %v771_v34 = vadd.f32 %v687_v30, %v685_v26 }
 0x1f5   : > { %863 = vadd.xlane.f32.xlu0 %v862_v11  ;;  %v883_v35 = vadd.f32 %v844_v31, %v843_v27  ;;  %v691_v36 = vpop.f32.mrb[24].mxu0  ;;  %v721_v37 = vpop.f32.mrb[8].mxu1  ;;  %v868_v38 = vadd.f32 %v834_v33, %v833_v29 }
 0x1f6   : > { %v835_v39 = vmul.f32 %v691_v36, %v691_v36  ;;  %v693_v40 = vpop.f32.mrb[25].mxu0  ;;  %v845_v41 = vmul.f32 %v721_v37, %v721_v37  ;;  %v723_v42 = vpop.f32.mrb[9].mxu1 }
 0x1f7   : > { %878 = vadd.xlane.f32.xlu1 %v877_v14  ;;  %v774_v43 = vadd.f32 %v693_v40, %v691_v36  ;;  %v836_v44 = vmul.f32 %v693_v40, %v693_v40  ;;  %v846_v45 = vmul.f32 %v723_v42, %v723_v42  ;;  %v789_v46 = vadd.f32 %v723_v42, %v721_v37 }
 0x1f9   : > { %769 = vadd.xlane.f32.xlu0 %v768_v20  ;;  %v727_v47 = vpop.f32.mrb[10].mxu1  ;;  %v871_v48 = vadd.f32 %v836_v44, %v835_v39  ;;  %v886_v49 = vadd.f32 %v846_v45, %v845_v41 }
 0x1fa   : > { %v847_v50 = vmul.f32 %v727_v47, %v727_v47  ;;  %v729_v51 = vpop.f32.mrb[11].mxu1 }
 0x1fb   : > { %866 = vadd.xlane.f32.xlu1 %v865_v24  ;;  %v848_v52 = vmul.f32 %v729_v51, %v729_v51  ;;  %v792_v53 = vadd.f32 %v729_v51, %v727_v47 }
 0x1fd   : > { %784 = vadd.xlane.f32.xlu0 %v783_v22  ;;  %v733_v54 = vpop.f32.mrb[12].mxu1  ;;  %v889_v55 = vadd.f32 %v848_v52, %v847_v50 }
 0x1fe   : > { %v849_v56 = vmul.f32 %v733_v54, %v733_v54  ;;  %v735_v57 = vpop.f32.mrb[13].mxu1 }
 0x1ff   : > { %787 = vadd.xlane.f32.xlu1 %v786_v32  ;;  %v850_v58 = vmul.f32 %v735_v57, %v735_v57  ;;  %v795_v59 = vadd.f32 %v735_v57, %v733_v54 }
 0x201   : > { %881 = vadd.xlane.f32.xlu0 %v880_v25  ;;  %v739_v60 = vpop.f32.mrb[14].mxu1  ;;  %v892_v61 = vadd.f32 %v850_v58, %v849_v56 }
 0x202   : > { %v851_v62 = vmul.f32 %v739_v60, %v739_v60  ;;  %v741_v63 = vpop.f32.mrb[15].mxu1 }
 0x203   : > { %884 = vadd.xlane.f32.xlu1 %v883_v35  ;;  %v852_v1 = vmul.f32 %v741_v63, %v741_v63  ;;  %v798_v0 = vadd.f32 %v741_v63, %v739_v60 }
 0x205   : > { %772 = vadd.xlane.f32.xlu0 %v771_v34  ;;  %v745_v2 = vpop.f32.mrb[16].mxu1  ;;  %v895_v3 = vadd.f32 %v852_v1, %v851_v62 }
 0x206   : > { %v853_v4 = vmul.f32 %v745_v2, %v745_v2  ;;  %v747_v5 = vpop.f32.mrb[17].mxu1 }
 0x207   : > { %775 = vadd.xlane.f32.xlu1 %v774_v43  ;;  %v854_v6 = vmul.f32 %v747_v5, %v747_v5  ;;  %v801_v7 = vadd.f32 %v747_v5, %v745_v2 }
 0x209   : > { %869 = vadd.xlane.f32.xlu0 %v868_v38  ;;  %v751_v8 = vpop.f32.mrb[18].mxu1  ;;  %v898_v9 = vadd.f32 %v854_v6, %v853_v4 }
 0x20a   : > { %v855_v10 = vmul.f32 %v751_v8, %v751_v8  ;;  %v753_v11 = vpop.f32.mrb[19].mxu1 }
 0x20b   : > { %872 = vadd.xlane.f32.xlu1 %v871_v48  ;;  %v856_v12 = vmul.f32 %v753_v11, %v753_v11  ;;  %v804_v13 = vadd.f32 %v753_v11, %v751_v8 }
 0x20d   : > { %790 = vadd.xlane.f32.xlu0 %v789_v46  ;;  %v757_v14 = vpop.f32.mrb[20].mxu1  ;;  %v901_v15 = vadd.f32 %v856_v12, %v855_v10 }
 0x20e   : > { %v857_v16 = vmul.f32 %v757_v14, %v757_v14  ;;  %v759_v17 = vpop.f32.mrb[21].mxu1 }
 0x20f   : > { %793 = vadd.xlane.f32.xlu1 %v792_v53  ;;  %v807_v18 = vadd.f32 %v759_v17, %v757_v14  ;;  %v858_v19 = vmul.f32 %v759_v17, %v759_v17 }
 0x211   : > { %887 = vadd.xlane.f32.xlu0 %v886_v49  ;;  %v904_v20 = vadd.f32 %v858_v19, %v857_v16 }
 0x213   : > { %890 = vadd.xlane.f32.xlu1 %v889_v55 }
 0x215   : > { %796 = vadd.xlane.f32.xlu0 %v795_v59 }
 0x217   : > { %799 = vadd.xlane.f32.xlu1 %v798_v0 }
 0x219   : > { %893 = vadd.xlane.f32.xlu0 %v892_v61 }
 0x21b   : > { %896 = vadd.xlane.f32.xlu1 %v895_v3 }
 0x21d   : > { %802 = vadd.xlane.f32.xlu0 %v801_v7 }
 0x21f   : > { %805 = vadd.xlane.f32.xlu1 %v804_v13 }
 0x221   : > { %899 = vadd.xlane.f32.xlu0 %v898_v9 }
 0x223   : > { %902 = vadd.xlane.f32.xlu1 %v901_v15 }
 0x225   : > { %808 = vadd.xlane.f32.xlu0 %v807_v18 }
 0x229   : > { %905 = vadd.xlane.f32.xlu0 %v904_v20 }
 0x276   : > { %v764_v21 = vpop.xlane.xlu0 %763 }
 0x277   : > { %811 = vst.msk [vmem:[%s1388_s30] sm:$0xff] %vm810_vm3, %v764_v21 }
 0x278   : > { %v861_v22 = vpop.xlane.xlu1 %860 }
 0x279   : > { %907 = vst.msk [vmem:[%s1393_s8] sm:$0xff] %vm810_vm3, %v861_v22 }
 0x27a   : > { %v779_v23 = vpop.xlane.xlu0 %778 }
 0x27b   : > { %816 = vst.msk [vmem:[%s1388_s30 + $0x28] sm:$0xff] %vm810_vm3, %v779_v23 }
 0x27c   : > { %v767_v24 = vpop.xlane.xlu1 %766 }
 0x27d   : > { %812 = vst.msk [vmem:[%s1388_s30 + $0x8] sm:$0xff] %vm810_vm3, %v767_v24 }
 0x27e   : > { %v876_v25 = vpop.xlane.xlu0 %875 }
 0x27f   : > { %912 = vst.msk [vmem:[%s1393_s8 + $0x28] sm:$0xff] %vm810_vm3, %v876_v25 }
 0x280   : > { %v782_v26 = vpop.xlane.xlu1 %781 }
 0x281   : > { %817 = vst.msk [vmem:[%s1388_s30 + $0x30] sm:$0xff] %vm810_vm3, %v782_v26 }
 0x282   : > { %v864_v27 = vpop.xlane.xlu0 %863 }
 0x283   : > { %908 = vst.msk [vmem:[%s1393_s8 + $0x8] sm:$0xff] %vm810_vm3, %v864_v27 }
 0x284   : > { %v879_v28 = vpop.xlane.xlu1 %878 }
 0x285   : > { %913 = vst.msk [vmem:[%s1393_s8 + $0x30] sm:$0xff] %vm810_vm3, %v879_v28 }
 0x286   : > { %v770_v29 = vpop.xlane.xlu0 %769 }
 0x287   : > { %813 = vst.msk [vmem:[%s1388_s30 + $0x10] sm:$0xff] %vm810_vm3, %v770_v29 }
 0x288   : > { %v867_v30 = vpop.xlane.xlu1 %866 }
 0x289   : > { %909 = vst.msk [vmem:[%s1393_s8 + $0x10] sm:$0xff] %vm810_vm3, %v867_v30 }
 0x28a   : > { %v785_v31 = vpop.xlane.xlu0 %784 }
 0x28b   : > { %818 = vst.msk [vmem:[%s1388_s30 + $0x38] sm:$0xff] %vm810_vm3, %v785_v31 }
 0x28c   : > { %v788_v32 = vpop.xlane.xlu1 %787 }
 0x28d   : > { %819 = vst.msk [vmem:[%s1388_s30 + $0x40] sm:$0xff] %vm810_vm3, %v788_v32 }
 0x28e   : > { %v882_v33 = vpop.xlane.xlu0 %881 }
 0x28f   : > { %914 = vst.msk [vmem:[%s1393_s8 + $0x38] sm:$0xff] %vm810_vm3, %v882_v33 }
 0x290   : > { %v885_v34 = vpop.xlane.xlu1 %884 }
 0x291   : > { %915 = vst.msk [vmem:[%s1393_s8 + $0x40] sm:$0xff] %vm810_vm3, %v885_v34 }
 0x292   : > { %v773_v35 = vpop.xlane.xlu0 %772 }
 0x293   : > { %814 = vst.msk [vmem:[%s1388_s30 + $0x18] sm:$0xff] %vm810_vm3, %v773_v35 }
 0x294   : > { %v776_v36 = vpop.xlane.xlu1 %775 }
 0x295   : > { %815 = vst.msk [vmem:[%s1388_s30 + $0x20] sm:$0xff] %vm810_vm3, %v776_v36 }
 0x296   : > { %v870_v37 = vpop.xlane.xlu0 %869 }
 0x297   : > { %910 = vst.msk [vmem:[%s1393_s8 + $0x18] sm:$0xff] %vm810_vm3, %v870_v37 }
 0x298   : > { %v873_v38 = vpop.xlane.xlu1 %872 }
 0x299   : > { %911 = vst.msk [vmem:[%s1393_s8 + $0x20] sm:$0xff] %vm810_vm3, %v873_v38 }
 0x29a   : > { %v791_v39 = vpop.xlane.xlu0 %790 }
 0x29b   : > { %820 = vst.msk [vmem:[%s1388_s30 + $0x48] sm:$0xff] %vm810_vm3, %v791_v39 }
 0x29c   : > { %v794_v40 = vpop.xlane.xlu1 %793 }
 0x29d   : > { %821 = vst.msk [vmem:[%s1388_s30 + $0x50] sm:$0xff] %vm810_vm3, %v794_v40 }
 0x29e   : > { %v888_v41 = vpop.xlane.xlu0 %887 }
 0x29f   : > { %916 = vst.msk [vmem:[%s1393_s8 + $0x48] sm:$0xff] %vm810_vm3, %v888_v41 }
 0x2a0   : > { %v891_v42 = vpop.xlane.xlu1 %890 }
 0x2a1   : > { %917 = vst.msk [vmem:[%s1393_s8 + $0x50] sm:$0xff] %vm810_vm3, %v891_v42 }
 0x2a2   : > { %v797_v43 = vpop.xlane.xlu0 %796 }
 0x2a3   : > { %822 = vst.msk [vmem:[%s1388_s30 + $0x58] sm:$0xff] %vm810_vm3, %v797_v43 }
 0x2a4   : > { %v800_v44 = vpop.xlane.xlu1 %799 }
 0x2a5   : > { %823 = vst.msk [vmem:[%s1388_s30 + $0x60] sm:$0xff] %vm810_vm3, %v800_v44 }
 0x2a6   : > { %v894_v45 = vpop.xlane.xlu0 %893 }
 0x2a7   : > { %918 = vst.msk [vmem:[%s1393_s8 + $0x58] sm:$0xff] %vm810_vm3, %v894_v45 }
 0x2a8   : > { %v897_v46 = vpop.xlane.xlu1 %896 }
 0x2a9   : > { %919 = vst.msk [vmem:[%s1393_s8 + $0x60] sm:$0xff] %vm810_vm3, %v897_v46 }
 0x2aa   : > { %v803_v47 = vpop.xlane.xlu0 %802 }
 0x2ab   : > { %824 = vst.msk [vmem:[%s1388_s30 + $0x68] sm:$0xff] %vm810_vm3, %v803_v47 }
 0x2ac   : > { %v806_v48 = vpop.xlane.xlu1 %805 }
 0x2ad   : > { %825 = vst.msk [vmem:[%s1388_s30 + $0x70] sm:$0xff] %vm810_vm3, %v806_v48 }
 0x2ae   : > { %v900_v49 = vpop.xlane.xlu0 %899 }
 0x2af   : > { %920 = vst.msk [vmem:[%s1393_s8 + $0x68] sm:$0xff] %vm810_vm3, %v900_v49 }
 0x2b0   : > { %v903_v50 = vpop.xlane.xlu1 %902 }
 0x2b1   : > { %921 = vst.msk [vmem:[%s1393_s8 + $0x70] sm:$0xff] %vm810_vm3, %v903_v50 }
 0x2b2   : > { %v809_v51 = vpop.xlane.xlu0 %808 }
 0x2b3   : > { %826 = vst.msk [vmem:[%s1388_s30 + $0x78] sm:$0xff] %vm810_vm3, %v809_v51 }
 0x2b6   : > { %v906_v52 = vpop.xlane.xlu0 %905 }
 0x2b7   : > { %922 = vst.msk [vmem:[%s1393_s8 + $0x78] sm:$0xff] %vm810_vm3, %v906_v52 }
 0x2b8 PF: > { %s16_s20 = sadd.s32 1, %s1182_s20   ;;  %s1474_s18 = smov %s1178_s19 }
 0x2b9   : > { %p13_p5 = scmp.ge.s32.totalorder %s16_s20, 4   ;;  %s1475_s19 = smov %s1477_s21 }
 0x2bb   :  { %15 = sbr.rel (!%p13_p5) target bundleno = 2 (0x2), region = 78 }

</bundles_post_ra>
